<compile_context>
chip_gen: v7x
topology: tpu7x:2x2x1
jax: 0.10.0
libtpu: 0.0.40
codegen_flags: <defaults>
</compile_context>

<pallas_src>
import jax
import jax.numpy as jnp
from jax.experimental import pallas as pl
from jax.experimental.pallas import tpu as pltpu

_LANE = 128  # TPU lane width; the padded output width of the last layer.


def _ffnn_kernel(x_ref, w1_ref, b1_ref, w2_ref, b2_ref,
                 w3_ref, b3_ref, w4_ref, b4_ref, o_ref):
    # All matmuls feed the MXU bf16 operands with f32 accumulation; bias add,
    # ReLU and sigmoid stay in f32 on the VPU/EUP.
    x = x_ref[...].astype(jnp.bfloat16)

    h = jnp.dot(x, w1_ref[...], preferred_element_type=jnp.float32)
    h = jnp.maximum(h + b1_ref[...], 0.0)

    h = jnp.dot(h.astype(jnp.bfloat16), w2_ref[...],
                preferred_element_type=jnp.float32)
    h = jnp.maximum(h + b2_ref[...], 0.0)

    h = jnp.dot(h.astype(jnp.bfloat16), w3_ref[...],
                preferred_element_type=jnp.float32)
    h = jnp.maximum(h + b3_ref[...], 0.0)

    # Output layer padded to 128 lanes: column 0 is the real logit, the rest are
    # zero-weight padding (sliced away in the wrapper).  Keeps the store lane-dense.
    z = jnp.dot(h.astype(jnp.bfloat16), w4_ref[...],
                preferred_element_type=jnp.float32) + b4_ref[...]
    o_ref[...] = jax.nn.sigmoid(z).astype(o_ref.dtype)


def _choose_batch_tile(B):
    """Largest tile (<=512, multiple of 8) that still yields >= 2 grid steps."""
    for cand in (512, 256, 128, 64, 32, 16, 8):
        if B % cand == 0 and B // cand >= 2:
            return cand
    return B  # tiny batches: a single full-batch step.


def deep_ffnn_forward(x, params, *, batch_tile=None):
    """x: (B, size) float32. params: w1..w4 (in,out) f32 and b1..b4 (1,out) f32."""
    B, size = x.shape
    if batch_tile is None:
        batch_tile = _choose_batch_tile(B)
    assert B % batch_tile == 0, "batch must be divisible by batch_tile"
    assert batch_tile == B or batch_tile % 8 == 0, (
        "batch_tile must be a multiple of 8 (f32 sublane) unless it covers the "
        "full batch")

    # Pre-cast weights to bf16 once (MXU-native; halves weight DMA + VMEM).
    w1 = params["w1"].astype(jnp.bfloat16)
    w2 = params["w2"].astype(jnp.bfloat16)
    w3 = params["w3"].astype(jnp.bfloat16)
    # Pad the 1-wide output layer to a full 128-lane slab (zeros beyond col 0).
    w4 = jnp.pad(params["w4"].astype(jnp.bfloat16), ((0, 0), (0, _LANE - 1)))
    b1, b2, b3 = params["b1"], params["b2"], params["b3"]
    b4 = jnp.pad(params["b4"], ((0, 0), (0, _LANE - 1)))

    grid = (B // batch_tile,)

    # --- VMEM budget (explicit; stays within v7x's 64 MiB physical VMEM). ---
    w_bytes = (w1.size + w2.size + w3.size + w4.size) * 2          # bf16
    b_bytes = (b1.size + b2.size + b3.size + b4.size) * 4          # f32
    io_bytes = 2 * batch_tile * size * 4 + 2 * batch_tile * _LANE * 4  # dbl-buf x/out
    act_bytes = 3 * batch_tile * (2 * size) * 4                    # live f32 intermediates
    vmem_est = 2 * w_bytes + b_bytes + io_bytes + act_bytes        # worst case dbl-buf weights
    vmem_limit = int(min(max(2 * vmem_est, 32 * 1024 * 1024), 64 * 1024 * 1024))

    # --- Cost estimate so XLA schedules around the custom call sensibly. ---
    flops = 2 * B * (size * 2 * size + 2 * size * 2 * size
                     + 2 * size * size + size * _LANE)
    cost = pl.CostEstimate(
        flops=int(flops),
        transcendentals=int(B * _LANE),                 # sigmoid exp over padded tile
        bytes_accessed=int(x.size * 4 + w_bytes + b_bytes + B * _LANE * 4))

    def run(single_buffer_weights):
        def resident(shape):
            # Block index is constant across the batch grid axis -> the tile is
            # DMA'd once; single-buffering it halves resident weight VMEM.
            idx = lambda i, _shape=shape: tuple(0 for _ in _shape)
            if single_buffer_weights:
                return pl.BlockSpec(shape, idx, pipeline_mode=pl.Buffered(1))
            return pl.BlockSpec(shape, idx)

        grid_spec = pltpu.PrefetchScalarGridSpec(
            num_scalar_prefetch=0,
            grid=grid,
            in_specs=[
                pl.BlockSpec((batch_tile, size), lambda i: (i, 0)),  # x tile
                resident(w1.shape), resident(b1.shape),
                resident(w2.shape), resident(b2.shape),
                resident(w3.shape), resident(b3.shape),
                resident(w4.shape), resident(b4.shape),
            ],
            out_specs=pl.BlockSpec((batch_tile, _LANE), lambda i: (i, 0)),
        )
        return pl.pallas_call(
            _ffnn_kernel,
            out_shape=jax.ShapeDtypeStruct((B, _LANE), jnp.float32),
            grid_spec=grid_spec,
            compiler_params=pltpu.CompilerParams(
                dimension_semantics=("parallel",),
                vmem_limit_bytes=vmem_limit),
            cost_estimate=cost,
        )(x, w1, b1, w2, b2, w3, b3, w4, b4)

    try:
        out_padded = run(single_buffer_weights=True)
    except Exception:
        # Fallback for jax versions where pipeline_mode=pl.Buffered(1) is not
        # supported in grid-based pallas_call lowering; semantics are identical.
        out_padded = run(single_buffer_weights=False)

    return out_padded[:, :1]  # real output lives in column 0 of the padded slab


def init_params(key, size):
    """Deterministic PyTorch-Linear-style init: U(-1/sqrt(fan_in), 1/sqrt(fan_in))."""
    dims = [(size, 2 * size), (2 * size, 2 * size), (2 * size, size), (size, 1)]
    params = {}
    for idx, (fan_in, fan_out) in enumerate(dims, start=1):
        key, kw, kb = jax.random.split(key, 3)
        bound = 1.0 / jnp.sqrt(jnp.float32(fan_in))
        params[f"w{idx}"] = jax.random.uniform(
            kw, (fan_in, fan_out), jnp.float32, -bound, bound)
        params[f"b{idx}"] = jax.random.uniform(
            kb, (1, fan_out), jnp.float32, -bound, bound)
    return params


def reference_forward_f32(x, p):
    h = jnp.maximum(x @ p["w1"] + p["b1"], 0.0)
    h = jnp.maximum(h @ p["w2"] + p["b2"], 0.0)
    h = jnp.maximum(h @ p["w3"] + p["b3"], 0.0)
    return jax.nn.sigmoid(h @ p["w4"] + p["b4"])


def reference_forward_bf16(x, p):
    # Same operand rounding as the kernel (bf16 operands, f32 accumulation).
    f = lambda a: a.astype(jnp.bfloat16)
    h = jnp.dot(f(x), f(p["w1"]), preferred_element_type=jnp.float32) + p["b1"]
    h = jnp.maximum(h, 0.0)
    h = jnp.dot(f(h), f(p["w2"]), preferred_element_type=jnp.float32) + p["b2"]
    h = jnp.maximum(h, 0.0)
    h = jnp.dot(f(h), f(p["w3"]), preferred_element_type=jnp.float32) + p["b3"]
    h = jnp.maximum(h, 0.0)
    z = jnp.dot(f(h), f(p["w4"]), preferred_element_type=jnp.float32) + p["b4"]
    return jax.nn.sigmoid(z)


if __name__ == "__main__":
    size = 32
    batch = 64  # -> batch_tile=32, grid=(2,): exercises pipelining / 2-TC sharding

    key = jax.random.PRNGKey(0)
    key, kx = jax.random.split(key)
    x = jax.random.normal(kx, (batch, size), jnp.float32)
    params = init_params(key, size)

    out = deep_ffnn_forward(x, params)
    out = jax.block_until_ready(out)
    assert out.shape == (batch, 1)

    # Tight check vs a reference with the same bf16 operand rounding.
    ref_bf16 = reference_forward_bf16(x, params)
    assert jnp.allclose(out, ref_bf16, atol=1e-4, rtol=0.0), "mismatch vs bf16 reference"

    # Loose check vs the pure-f32 PyTorch-equivalent math (bf16 operand rounding
    # changes results at the ~1e-3 level; sigmoid output is in [0, 1]).
    ref_f32 = reference_forward_f32(x, params)
    assert jnp.allclose(out, ref_f32, atol=2e-2, rtol=0.0), "mismatch vs f32 reference"

    print("KERNEL_OK")
</pallas_src>

<mosaic_0001>
module attributes {stable_mosaic.version = 11 : i64} {
  func.func @_ffnn_kernel(%arg0: i32, %arg1: memref<32x32xf32, #tpu.memory_space<vmem>>, %arg2: memref<32x64xbf16, #tpu.memory_space<vmem>>, %arg3: memref<1x64xf32, #tpu.memory_space<vmem>>, %arg4: memref<64x64xbf16, #tpu.memory_space<vmem>>, %arg5: memref<1x64xf32, #tpu.memory_space<vmem>>, %arg6: memref<64x32xbf16, #tpu.memory_space<vmem>>, %arg7: memref<1x32xf32, #tpu.memory_space<vmem>>, %arg8: memref<32x128xbf16, #tpu.memory_space<vmem>>, %arg9: memref<1x128xf32, #tpu.memory_space<vmem>>, %arg10: memref<32x128xf32, #tpu.memory_space<vmem>>) attributes {dimension_semantics = [#tpu.dimension_semantics<parallel>], iteration_bounds = array<i64: 2>, scalar_prefetch = 0 : i64, scratch_operands = 0 : i64, tpu.core_type = #tpu.core_type<tc>, window_params = [{transform_indices = @transform_0, window_bounds = array<i64: 32, 32>}, {pipeline_mode = #tpu.pipeline_mode<synchronous>, transform_indices = @transform_1, window_bounds = array<i64: 32, 64>}, {pipeline_mode = #tpu.pipeline_mode<synchronous>, transform_indices = @transform_2, window_bounds = array<i64: 1, 64>}, {pipeline_mode = #tpu.pipeline_mode<synchronous>, transform_indices = @transform_3, window_bounds = array<i64: 64, 64>}, {pipeline_mode = #tpu.pipeline_mode<synchronous>, transform_indices = @transform_4, window_bounds = array<i64: 1, 64>}, {pipeline_mode = #tpu.pipeline_mode<synchronous>, transform_indices = @transform_5, window_bounds = array<i64: 64, 32>}, {pipeline_mode = #tpu.pipeline_mode<synchronous>, transform_indices = @transform_6, window_bounds = array<i64: 1, 32>}, {pipeline_mode = #tpu.pipeline_mode<synchronous>, transform_indices = @transform_7, window_bounds = array<i64: 32, 128>}, {pipeline_mode = #tpu.pipeline_mode<synchronous>, transform_indices = @transform_8, window_bounds = array<i64: 1, 128>}, {transform_indices = @transform_9, window_bounds = array<i64: 32, 128>}]} {
    %c0 = arith.constant 0 : index
    %c0_0 = arith.constant 0 : index
    %0 = vector.load %arg1[%c0, %c0_0] : memref<32x32xf32, #tpu.memory_space<vmem>>, vector<32x32xf32>
    %1 = arith.truncf %0 : vector<32x32xf32> to vector<32x32xbf16>
    %c0_1 = arith.constant 0 : index
    %c0_2 = arith.constant 0 : index
    %2 = vector.load %arg2[%c0_1, %c0_2] : memref<32x64xbf16, #tpu.memory_space<vmem>>, vector<32x64xbf16>
    %cst = arith.constant dense<0.000000e+00> : vector<32x64xf32>
    %3 = tpu.matmul %1, %2, %cst {dimension_numbers = #tpu.dot_dimension_numbers<[1], [0], [0], [1], [0, 0, 1, 1], [], []>} : vector<32x32xbf16>, vector<32x64xbf16>, vector<32x64xf32> -> vector<32x64xf32>
    %c0_3 = arith.constant 0 : index
    %c0_4 = arith.constant 0 : index
    %4 = vector.load %arg3[%c0_3, %c0_4] : memref<1x64xf32, #tpu.memory_space<vmem>>, vector<1x64xf32>
    %5 = vector.broadcast %4 : vector<1x64xf32> to vector<32x64xf32>
    %6 = arith.addf %3, %5 : vector<32x64xf32>
    %cst_5 = arith.constant 0.000000e+00 : f32
    %7 = vector.broadcast %cst_5 : f32 to vector<32x64xf32>
    %8 = arith.maximumf %6, %7 : vector<32x64xf32>
    %9 = arith.truncf %8 : vector<32x64xf32> to vector<32x64xbf16>
    %c0_6 = arith.constant 0 : index
    %c0_7 = arith.constant 0 : index
    %10 = vector.load %arg4[%c0_6, %c0_7] : memref<64x64xbf16, #tpu.memory_space<vmem>>, vector<64x64xbf16>
    %cst_8 = arith.constant dense<0.000000e+00> : vector<32x64xf32>
    %11 = tpu.matmul %9, %10, %cst_8 {dimension_numbers = #tpu.dot_dimension_numbers<[1], [0], [0], [1], [0, 0, 1, 1], [], []>} : vector<32x64xbf16>, vector<64x64xbf16>, vector<32x64xf32> -> vector<32x64xf32>
    %c0_9 = arith.constant 0 : index
    %c0_10 = arith.constant 0 : index
    %12 = vector.load %arg5[%c0_9, %c0_10] : memref<1x64xf32, #tpu.memory_space<vmem>>, vector<1x64xf32>
    %13 = vector.broadcast %12 : vector<1x64xf32> to vector<32x64xf32>
    %14 = arith.addf %11, %13 : vector<32x64xf32>
    %cst_11 = arith.constant 0.000000e+00 : f32
    %15 = vector.broadcast %cst_11 : f32 to vector<32x64xf32>
    %16 = arith.maximumf %14, %15 : vector<32x64xf32>
    %17 = arith.truncf %16 : vector<32x64xf32> to vector<32x64xbf16>
    %c0_12 = arith.constant 0 : index
    %c0_13 = arith.constant 0 : index
    %18 = vector.load %arg6[%c0_12, %c0_13] : memref<64x32xbf16, #tpu.memory_space<vmem>>, vector<64x32xbf16>
    %cst_14 = arith.constant dense<0.000000e+00> : vector<32x32xf32>
    %19 = tpu.matmul %17, %18, %cst_14 {dimension_numbers = #tpu.dot_dimension_numbers<[1], [0], [0], [1], [0, 0, 1, 1], [], []>} : vector<32x64xbf16>, vector<64x32xbf16>, vector<32x32xf32> -> vector<32x32xf32>
    %c0_15 = arith.constant 0 : index
    %c0_16 = arith.constant 0 : index
    %20 = vector.load %arg7[%c0_15, %c0_16] : memref<1x32xf32, #tpu.memory_space<vmem>>, vector<1x32xf32>
    %21 = vector.broadcast %20 : vector<1x32xf32> to vector<32x32xf32>
    %22 = arith.addf %19, %21 : vector<32x32xf32>
    %cst_17 = arith.constant 0.000000e+00 : f32
    %23 = vector.broadcast %cst_17 : f32 to vector<32x32xf32>
    %24 = arith.maximumf %22, %23 : vector<32x32xf32>
    %25 = arith.truncf %24 : vector<32x32xf32> to vector<32x32xbf16>
    %c0_18 = arith.constant 0 : index
    %c0_19 = arith.constant 0 : index
    %26 = vector.load %arg8[%c0_18, %c0_19] : memref<32x128xbf16, #tpu.memory_space<vmem>>, vector<32x128xbf16>
    %cst_20 = arith.constant dense<0.000000e+00> : vector<32x128xf32>
    %27 = tpu.matmul %25, %26, %cst_20 {dimension_numbers = #tpu.dot_dimension_numbers<[1], [0], [0], [1], [0, 0, 1, 1], [], []>} : vector<32x32xbf16>, vector<32x128xbf16>, vector<32x128xf32> -> vector<32x128xf32>
    %c0_21 = arith.constant 0 : index
    %c0_22 = arith.constant 0 : index
    %28 = vector.load %arg9[%c0_21, %c0_22] : memref<1x128xf32, #tpu.memory_space<vmem>>, vector<1x128xf32>
    %29 = vector.broadcast %28 : vector<1x128xf32> to vector<32x128xf32>
    %30 = arith.addf %27, %29 : vector<32x128xf32>
    %31 = arith.negf %30 : vector<32x128xf32>
    %32 = math.exp %31 : vector<32x128xf32>
    %cst_23 = arith.constant 1.000000e+00 : f32
    %33 = vector.broadcast %cst_23 : f32 to vector<32x128xf32>
    %34 = arith.addf %33, %32 : vector<32x128xf32>
    %35 = arith.divf %33, %34 : vector<32x128xf32>
    %c0_24 = arith.constant 0 : index
    %c0_25 = arith.constant 0 : index
    %36 = vector.load %arg10[%c0_24, %c0_25] : memref<32x128xf32, #tpu.memory_space<vmem>>, vector<32x128xf32>
    tpu.vector_store %arg10[%c0_24, %c0_25], %35 {strides = array<i32>} : memref<32x128xf32, #tpu.memory_space<vmem>>, vector<32x128xf32>,
    return
  }
  func.func @transform_0(%arg0: i32) -> (i32, i32) {
    %c0_i32 = arith.constant 0 : i32
    %c0_i32_0 = arith.constant 0 : i32
    return %arg0, %c0_i32 : i32, i32
  }
  func.func @transform_1(%arg0: i32) -> (i32, i32) {
    %c0_i32 = arith.constant 0 : i32
    %c0_i32_0 = arith.constant 0 : i32
    %c0_i32_1 = arith.constant 0 : i32
    return %c0_i32, %c0_i32_0 : i32, i32
  }
  func.func @transform_2(%arg0: i32) -> (i32, i32) {
    %c0_i32 = arith.constant 0 : i32
    %c0_i32_0 = arith.constant 0 : i32
    %c0_i32_1 = arith.constant 0 : i32
    return %c0_i32, %c0_i32_0 : i32, i32
  }
  func.func @transform_3(%arg0: i32) -> (i32, i32) {
    %c0_i32 = arith.constant 0 : i32
    %c0_i32_0 = arith.constant 0 : i32
    %c0_i32_1 = arith.constant 0 : i32
    return %c0_i32, %c0_i32_0 : i32, i32
  }
  func.func @transform_4(%arg0: i32) -> (i32, i32) {
    %c0_i32 = arith.constant 0 : i32
    %c0_i32_0 = arith.constant 0 : i32
    %c0_i32_1 = arith.constant 0 : i32
    return %c0_i32, %c0_i32_0 : i32, i32
  }
  func.func @transform_5(%arg0: i32) -> (i32, i32) {
    %c0_i32 = arith.constant 0 : i32
    %c0_i32_0 = arith.constant 0 : i32
    %c0_i32_1 = arith.constant 0 : i32
    return %c0_i32, %c0_i32_0 : i32, i32
  }
  func.func @transform_6(%arg0: i32) -> (i32, i32) {
    %c0_i32 = arith.constant 0 : i32
    %c0_i32_0 = arith.constant 0 : i32
    %c0_i32_1 = arith.constant 0 : i32
    return %c0_i32, %c0_i32_0 : i32, i32
  }
  func.func @transform_7(%arg0: i32) -> (i32, i32) {
    %c0_i32 = arith.constant 0 : i32
    %c0_i32_0 = arith.constant 0 : i32
    %c0_i32_1 = arith.constant 0 : i32
    return %c0_i32, %c0_i32_0 : i32, i32
  }
  func.func @transform_8(%arg0: i32) -> (i32, i32) {
    %c0_i32 = arith.constant 0 : i32
    %c0_i32_0 = arith.constant 0 : i32
    %c0_i32_1 = arith.constant 0 : i32
    return %c0_i32, %c0_i32_0 : i32, i32
  }
  func.func @transform_9(%arg0: i32) -> (i32, i32) {
    %c0_i32 = arith.constant 0 : i32
    %c0_i32_0 = arith.constant 0 : i32
    return %arg0, %c0_i32 : i32, i32
  }
}

module attributes {stable_mosaic.version = 11 : i64} {
  func.func @_ffnn_kernel(%arg0: i32, %arg1: memref<32x32xf32, #tpu.memory_space<vmem>>, %arg2: memref<32x64xbf16, #tpu.memory_space<vmem>>, %arg3: memref<1x64xf32, #tpu.memory_space<vmem>>, %arg4: memref<64x64xbf16, #tpu.memory_space<vmem>>, %arg5: memref<1x64xf32, #tpu.memory_space<vmem>>, %arg6: memref<64x32xbf16, #tpu.memory_space<vmem>>, %arg7: memref<1x32xf32, #tpu.memory_space<vmem>>, %arg8: memref<32x128xbf16, #tpu.memory_space<vmem>>, %arg9: memref<1x128xf32, #tpu.memory_space<vmem>>, %arg10: memref<32x128xf32, #tpu.memory_space<vmem>>) attributes {dimension_semantics = [#tpu.dimension_semantics<parallel>], iteration_bounds = array<i64: 2>, scalar_prefetch = 0 : i64, scratch_operands = 0 : i64, tpu.core_type = #tpu.core_type<tc>, window_params = [{transform_indices = @transform_0, window_bounds = array<i64: 32, 32>}, {pipeline_mode = #tpu.pipeline_mode<synchronous>, transform_indices = @transform_1, window_bounds = array<i64: 32, 64>}, {pipeline_mode = #tpu.pipeline_mode<synchronous>, transform_indices = @transform_2, window_bounds = array<i64: 1, 64>}, {pipeline_mode = #tpu.pipeline_mode<synchronous>, transform_indices = @transform_3, window_bounds = array<i64: 64, 64>}, {pipeline_mode = #tpu.pipeline_mode<synchronous>, transform_indices = @transform_4, window_bounds = array<i64: 1, 64>}, {pipeline_mode = #tpu.pipeline_mode<synchronous>, transform_indices = @transform_5, window_bounds = array<i64: 64, 32>}, {pipeline_mode = #tpu.pipeline_mode<synchronous>, transform_indices = @transform_6, window_bounds = array<i64: 1, 32>}, {pipeline_mode = #tpu.pipeline_mode<synchronous>, transform_indices = @transform_7, window_bounds = array<i64: 32, 128>}, {pipeline_mode = #tpu.pipeline_mode<synchronous>, transform_indices = @transform_8, window_bounds = array<i64: 1, 128>}, {transform_indices = @transform_9, window_bounds = array<i64: 32, 128>}]} {
    %c0 = arith.constant 0 : index
    %c0_0 = arith.constant 0 : index
    %0 = vector.load %arg1[%c0, %c0_0] : memref<32x32xf32, #tpu.memory_space<vmem>>, vector<32x32xf32>
    %1 = arith.truncf %0 : vector<32x32xf32> to vector<32x32xbf16>
    %c0_1 = arith.constant 0 : index
    %c0_2 = arith.constant 0 : index
    %2 = vector.load %arg2[%c0_1, %c0_2] : memref<32x64xbf16, #tpu.memory_space<vmem>>, vector<32x64xbf16>
    %cst = arith.constant dense<0.000000e+00> : vector<32x64xf32>
    %3 = tpu.matmul %1, %2, %cst {dimension_numbers = #tpu.dot_dimension_numbers<[1], [0], [0], [1], [0, 0, 1, 1], [], []>} : vector<32x32xbf16>, vector<32x64xbf16>, vector<32x64xf32> -> vector<32x64xf32>
    %c0_3 = arith.constant 0 : index
    %c0_4 = arith.constant 0 : index
    %4 = vector.load %arg3[%c0_3, %c0_4] : memref<1x64xf32, #tpu.memory_space<vmem>>, vector<1x64xf32>
    %5 = vector.broadcast %4 : vector<1x64xf32> to vector<32x64xf32>
    %6 = arith.addf %3, %5 : vector<32x64xf32>
    %cst_5 = arith.constant 0.000000e+00 : f32
    %7 = vector.broadcast %cst_5 : f32 to vector<32x64xf32>
    %8 = arith.maximumf %6, %7 : vector<32x64xf32>
    %9 = arith.truncf %8 : vector<32x64xf32> to vector<32x64xbf16>
    %c0_6 = arith.constant 0 : index
    %c0_7 = arith.constant 0 : index
    %10 = vector.load %arg4[%c0_6, %c0_7] : memref<64x64xbf16, #tpu.memory_space<vmem>>, vector<64x64xbf16>
    %cst_8 = arith.constant dense<0.000000e+00> : vector<32x64xf32>
    %11 = tpu.matmul %9, %10, %cst_8 {dimension_numbers = #tpu.dot_dimension_numbers<[1], [0], [0], [1], [0, 0, 1, 1], [], []>} : vector<32x64xbf16>, vector<64x64xbf16>, vector<32x64xf32> -> vector<32x64xf32>
    %c0_9 = arith.constant 0 : index
    %c0_10 = arith.constant 0 : index
    %12 = vector.load %arg5[%c0_9, %c0_10] : memref<1x64xf32, #tpu.memory_space<vmem>>, vector<1x64xf32>
    %13 = vector.broadcast %12 : vector<1x64xf32> to vector<32x64xf32>
    %14 = arith.addf %11, %13 : vector<32x64xf32>
    %cst_11 = arith.constant 0.000000e+00 : f32
    %15 = vector.broadcast %cst_11 : f32 to vector<32x64xf32>
    %16 = arith.maximumf %14, %15 : vector<32x64xf32>
    %17 = arith.truncf %16 : vector<32x64xf32> to vector<32x64xbf16>
    %c0_12 = arith.constant 0 : index
    %c0_13 = arith.constant 0 : index
    %18 = vector.load %arg6[%c0_12, %c0_13] : memref<64x32xbf16, #tpu.memory_space<vmem>>, vector<64x32xbf16>
    %cst_14 = arith.constant dense<0.000000e+00> : vector<32x32xf32>
    %19 = tpu.matmul %17, %18, %cst_14 {dimension_numbers = #tpu.dot_dimension_numbers<[1], [0], [0], [1], [0, 0, 1, 1], [], []>} : vector<32x64xbf16>, vector<64x32xbf16>, vector<32x32xf32> -> vector<32x32xf32>
    %c0_15 = arith.constant 0 : index
    %c0_16 = arith.constant 0 : index
    %20 = vector.load %arg7[%c0_15, %c0_16] : memref<1x32xf32, #tpu.memory_space<vmem>>, vector<1x32xf32>
    %21 = vector.broadcast %20 : vector<1x32xf32> to vector<32x32xf32>
    %22 = arith.addf %19, %21 : vector<32x32xf32>
    %cst_17 = arith.constant 0.000000e+00 : f32
    %23 = vector.broadcast %cst_17 : f32 to vector<32x32xf32>
    %24 = arith.maximumf %22, %23 : vector<32x32xf32>
    %25 = arith.truncf %24 : vector<32x32xf32> to vector<32x32xbf16>
    %c0_18 = arith.constant 0 : index
    %c0_19 = arith.constant 0 : index
    %26 = vector.load %arg8[%c0_18, %c0_19] : memref<32x128xbf16, #tpu.memory_space<vmem>>, vector<32x128xbf16>
    %cst_20 = arith.constant dense<0.000000e+00> : vector<32x128xf32>
    %27 = tpu.matmul %25, %26, %cst_20 {dimension_numbers = #tpu.dot_dimension_numbers<[1], [0], [0], [1], [0, 0, 1, 1], [], []>} : vector<32x32xbf16>, vector<32x128xbf16>, vector<32x128xf32> -> vector<32x128xf32>
    %c0_21 = arith.constant 0 : index
    %c0_22 = arith.constant 0 : index
    %28 = vector.load %arg9[%c0_21, %c0_22] : memref<1x128xf32, #tpu.memory_space<vmem>>, vector<1x128xf32>
    %29 = vector.broadcast %28 : vector<1x128xf32> to vector<32x128xf32>
    %30 = arith.addf %27, %29 : vector<32x128xf32>
    %31 = arith.negf %30 : vector<32x128xf32>
    %32 = math.exp %31 : vector<32x128xf32>
    %cst_23 = arith.constant 1.000000e+00 : f32
    %33 = vector.broadcast %cst_23 : f32 to vector<32x128xf32>
    %34 = arith.addf %33, %32 : vector<32x128xf32>
    %35 = arith.divf %33, %34 : vector<32x128xf32>
    %c0_24 = arith.constant 0 : index
    %c0_25 = arith.constant 0 : index
    %36 = vector.load %arg10[%c0_24, %c0_25] : memref<32x128xf32, #tpu.memory_space<vmem>>, vector<32x128xf32>
    tpu.vector_store %arg10[%c0_24, %c0_25], %35 {strides = array<i32>} : memref<32x128xf32, #tpu.memory_space<vmem>>, vector<32x128xf32>,
    return
  }
  func.func @transform_0(%arg0: i32) -> (i32, i32) {
    %c0_i32 = arith.constant 0 : i32
    %c0_i32_0 = arith.constant 0 : i32
    return %arg0, %c0_i32 : i32, i32
  }
  func.func @transform_1(%arg0: i32) -> (i32, i32) {
    %c0_i32 = arith.constant 0 : i32
    %c0_i32_0 = arith.constant 0 : i32
    %c0_i32_1 = arith.constant 0 : i32
    return %c0_i32, %c0_i32_0 : i32, i32
  }
  func.func @transform_2(%arg0: i32) -> (i32, i32) {
    %c0_i32 = arith.constant 0 : i32
    %c0_i32_0 = arith.constant 0 : i32
    %c0_i32_1 = arith.constant 0 : i32
    return %c0_i32, %c0_i32_0 : i32, i32
  }
  func.func @transform_3(%arg0: i32) -> (i32, i32) {
    %c0_i32 = arith.constant 0 : i32
    %c0_i32_0 = arith.constant 0 : i32
    %c0_i32_1 = arith.constant 0 : i32
    return %c0_i32, %c0_i32_0 : i32, i32
  }
  func.func @transform_4(%arg0: i32) -> (i32, i32) {
    %c0_i32 = arith.constant 0 : i32
    %c0_i32_0 = arith.constant 0 : i32
    %c0_i32_1 = arith.constant 0 : i32
    return %c0_i32, %c0_i32_0 : i32, i32
  }
  func.func @transform_5(%arg0: i32) -> (i32, i32) {
    %c0_i32 = arith.constant 0 : i32
    %c0_i32_0 = arith.constant 0 : i32
    %c0_i32_1 = arith.constant 0 : i32
    return %c0_i32, %c0_i32_0 : i32, i32
  }
  func.func @transform_6(%arg0: i32) -> (i32, i32) {
    %c0_i32 = arith.constant 0 : i32
    %c0_i32_0 = arith.constant 0 : i32
    %c0_i32_1 = arith.constant 0 : i32
    return %c0_i32, %c0_i32_0 : i32, i32
  }
  func.func @transform_7(%arg0: i32) -> (i32, i32) {
    %c0_i32 = arith.constant 0 : i32
    %c0_i32_0 = arith.constant 0 : i32
    %c0_i32_1 = arith.constant 0 : i32
    return %c0_i32, %c0_i32_0 : i32, i32
  }
  func.func @transform_8(%arg0: i32) -> (i32, i32) {
    %c0_i32 = arith.constant 0 : i32
    %c0_i32_0 = arith.constant 0 : i32
    %c0_i32_1 = arith.constant 0 : i32
    return %c0_i32, %c0_i32_0 : i32, i32
  }
  func.func @transform_9(%arg0: i32) -> (i32, i32) {
    %c0_i32 = arith.constant 0 : i32
    %c0_i32_0 = arith.constant 0 : i32
    return %arg0, %c0_i32 : i32, i32
  }
}

</mosaic_0001>

<bundles_post_ra>
// kernel: tpu_custom_call.1
= control target key start
LH: loop header
LB: loop body
LE: loop exit
PB: predicated region body
PF: predicated region fallthrough
CT: control target
= control target key end

     0   :  { %14 = vsyncpa [#allocation3], 0  ;;  %s1254_s0 = inlined_call_operand.vmem [shape: f32[64,32], index: 0, kind: input, shape index: {}]   ;;  %s1255_s1 = inlined_call_operand.vmem [shape: bf16[32,64], index: 1, kind: input, shape index: {}]   ;;  %s1256_s2 = inlined_call_operand.vmem [shape: f32[1,64], index: 2, kind: input, shape index: {}]   ;;  %s1257_s3 = inlined_call_operand.vmem [shape: bf16[64,64], index: 3, kind: input, shape index: {}]   ;;  %s1258_s4 = inlined_call_operand.vmem [shape: f32[1,64], index: 4, kind: input, shape index: {}]   ;;  %s1259_s5 = inlined_call_operand.vmem [shape: bf16[64,32], index: 5, kind: input, shape index: {}]   ;;  %s1260_s6 = inlined_call_operand.vmem [shape: f32[1,32], index: 6, kind: input, shape index: {}]   ;;  %s1261_s7 = inlined_call_operand.vmem [shape: bf16[32,128], index: 7, kind: input, shape index: {}]   ;;  %s1262_s8 = inlined_call_operand.vmem [shape: f32[1,128], index: 8, kind: input, shape index: {}]   ;;  %s1263_s9 = inlined_call_operand.hbm [shape: f32[64,128], index: 9, kind: output, shape index: {}]  }
   0x1   :  { %16 = vsyncpa [#allocation3 + $0x1], 0  ;;  %s1096_s30 = smov 0   ;;  %s1098_s10 = smov 0  }
   0x2   :  { %s1100_s11 = smov 0   ;;  %s1102_s12 = smov 0  }
   0x3 LB: > { %s1117_s13 = sadd.s32 4294967295, %s1041_s12   ;;  %s809_s14 = sadd.s32 4294967294, %s1041_s12   ;;  %s1041_s12 = sphi %s1102_s12, %s1269_s12   ;;  %s1037_s11 = sphi %s1100_s11, %s1268_s11   ;;  %s1033_s10 = sphi %s1098_s10, %s1267_s10   ;;  %s1029_s30 = sphi %s1096_s30, %s1266_s30  }
   0x4   : > { %s1121_s15 = sadd.s32 1, %s1041_s12   ;;  %s223_s16 = sadd.s32 1, %s1037_s11 }
   0x5   : > { %s220_s17 = ssub.s32 %s1041_s12, %s1121_s15  ;;  %p233_p0 = scmp.ne.s32.totalorder %s1037_s11, %s1033_s10 }
   0x6   : > { %p221_p1 = scmp.eq.s32.totalorder %s220_s17, 0  ;;  %p234_p2 = scmp.eq.s32.totalorder %s1117_s13, 1 }
   0x7   : > { %p239_p3 = scmp.ne.s32.totalorder %s1033_s10, %s1029_s30  ;;  %p240_p4 = scmp.eq.s32.totalorder %s809_s14, 1 }
   0x8   : > { %s1132_s18 = scalar_select %p221_p1, %s1037_s11, %s223_s16  }
   0x9   : > { %p1134_p5 = por %p234_p2, %p233_p0  ;;  %p1138_p6 = por %p240_p4, %p239_p3 }
   0xa   : > { %p812_p7 = scmp.ge.s32.totalorder %s1041_s12, 1  ;;  %p291_p8 = scmp.lt.s32.totalorder %s1041_s12, 3 }
   0xc   : > { %p292_p9 = pnand %p812_p7, %p291_p8 }
   0xd   : > { %v951_v0 = vld [vmem:[%s1255_s1] sm:$0xff] (!%p292_p9)   ;;  %s814_s23 = sshll.u32 (!%p292_p9), %s1117_s13, 2  ;;  %v952_v1 = vld [vmem:[%s1255_s1 + $0x8] sm:$0xff] (!%p292_p9)   ;;  %vm364_vm0 = vcmask (!%p292_p9), 261120   ;;  %v955_v10 = vld [vmem:[%s1257_s3 + $0x10] sm:$0xff] (!%p292_p9)   ;;  %vm465_vm1 = vcmask (!%p292_p9), 523264  }
   0xe   : > { %295 = sbr.rel (%p292_p9) target bundleno = 952 (0x3b8), region = 56  ;;  %p328_p10 = scmp.lt.s32.totalorder (!%p292_p9), %s814_s23, 7  ;;  %870 = vmatprep.subr.bf16.mxu0 (!%p292_p9), %v951_v0  ;;  %v953_v2 = vld [vmem:[%s1257_s3] sm:$0xff] (!%p292_p9)   ;;  %v954_v3 = vld [vmem:[%s1257_s3 + $0x8] sm:$0xff] (!%p292_p9)   ;;  %v956_v11 = vld [vmem:[%s1257_s3 + $0x18] sm:$0xff] (!%p292_p9)  }
   0xf   : > { %871 = vmatpush3.bf16.msra.mxu0 (!%p292_p9), %v951_v0  ;;  %878 = vmatprep.subr.bf16.mxu1 (!%p292_p9), %v953_v2  ;;  %v957_v12 = vld [vmem:[%s1259_s5] sm:$0xff] (!%p292_p9)   ;;  %v958_v13 = vld [vmem:[%s1259_s5 + $0x8] sm:$0xff] (!%p292_p9)   ;;  %v959_v29 = vld [vmem:[%s1259_s5 + $0x10] sm:$0xff] (!%p292_p9)   ;;  %s324_s22 = sand.u32 (!%p292_p9), 1, %s1033_s10   ;;  %s849_s24 = sshll.u32 (!%p292_p9), %s1117_s13, 9 }
  0x10   : > { %872 = vmatprep.subr.bf16.mxu0 (!%p292_p9), %v952_v1  ;;  %879 = vmatpush3.bf16.msra.mxu1 (!%p292_p9), %v953_v2  ;;  %v816_v14 = vld [vmem:[%s1256_s2] ss:$0 sm:$0xff] (!%p292_p9)  ;;  %v960_v30 = vld [vmem:[%s1259_s5 + $0x18] sm:$0xff] (!%p292_p9)   ;;  %v962_v47 = vld [vmem:[%s1261_s7 + $0x8] sm:$0xff] (!%p292_p9)   ;;  %s1209_s29 = scalar_lea.hbm (!%p292_p9), %s1263_s9, %s849_s24  ;;  %s1213_s13 = scalar_lea.sflag (!%p292_p9), [#allocation3], %s324_s22 }
  0x11   : > { %880 = vmatprep.subr.bf16.mxu1 (!%p292_p9), %v954_v3  ;;  %v821_v31 = vld [vmem:[%s1258_s4] ss:$0 sm:$0xff] (!%p292_p9)  ;;  %s1043_s16 = smov (!%p292_p9), [#allocation2]  }
  0x12   : > { %v961_v46 = vld [vmem:[%s1261_s7] sm:$0xff] (!%p292_p9)   ;;  %s983_s17 = sshll.u32 (!%p292_p9), %s1043_s16, 4  ;;  %s984_s17 = int_to_ptr.vmem [resolvable:$false] %s983_s17 }
  0x13   : > { %873 = vmatpush3.bf16.msra.mxu0 (!%p292_p9), %v952_v1  ;;  %v828_v48 = vld [vmem:[%s1260_s6] ss:$0 sm:$0xff] (!%p292_p9) }
  0x14   : > { %881 = vmatpush3.bf16.msra.mxu1 (!%p292_p9), %v954_v3  ;;  %890 = vmatprep.subr.bf16.mxu0 (!%p292_p9), %v957_v12  ;;  %v835_v63 = vld [vmem:[%s1262_s8] ss:$0 sm:$0xff] (!%p292_p9) }
  0x15   : > { %s1271_s23 = smov (!%p328_p10, %s814_s23), 7  ;;  %882 = vmatprep.subr.bf16.mxu1 %v955_v10 }
  0x16   : > { %s815_s14 = sshll.u32 %s1271_s23, 3  ;;  %s813_s23 = sshll.u32 %s324_s22, 5 }
  0x17   : > { %s331_s21 = scalar_lea.vmem %s1254_s0, %s815_s14  ;;  %s326_s25 = scalar_lea.vmem [#allocation2], %s813_s23 }
  0x18   : > { %v335_v4 = vld [vmem:[%s331_s21] sm:$0xff]  ;;  %v336_v5 = vld [vmem:[%s331_s21 + $0x8] sm:$0xff]  ;;  %v337_v6 = vld [vmem:[%s331_s21 + $0x10] sm:$0xff]  ;;  %883 = vmatpush3.bf16.msra.mxu1 %v955_v10  ;;  %s747_s26 = sshll.u32 %s326_s25, 4  ;;  %s1211_s26 = int_to_ptr.vmem [resolvable:$true] %s747_s26 }
  0x19   : > { %v339_v7 = vpack.c.bf16 %v336_v5, %v335_v4  ;;  %v338_v8 = vld [vmem:[%s331_s21 + $0x18] sm:$0xff]  ;;  %884 = vmatprep.subr.bf16.mxu1 %v956_v11  ;;  %s979_s14 = scalar_lea.vmem %s1211_s26, 512  ;;  %s985_s21 = scalar_lea.vmem %s984_s17, 1024 }
  0x1a   : > { %v340_v9 = vpack.c.bf16 %v338_v8, %v337_v6  ;;  %p980_p11 = scmp.ne.s32.totalorder %s1211_s26, %s979_s14  ;;  %p986_p0 = scmp.lt.s32.totalorder %s1211_s26, %s984_s17 }
  0x1b   : > { %874 = vmatprep.mubr.msk.bf16.mxu0 %vm364_vm0, %v339_v7  ;;  %p987_p1 = scmp.lt.s32.totalorder %s985_s21, %s979_s14 }
  0x1c   : > { %875 = vmatmul.mubr.msk.bf16.vlgmr.msra.gmra.mrb[0].mxu0 %vm364_vm0, %v340_v9  ;;  %885 = vmatpush3.bf16.msra.mxu1 %v956_v11  ;;  %p981_p12 = pnand %p980_p11, %p1134_p5 }
  0x1d   : > { %891 = vmatpush3.bf16.msra.mxu0 %v957_v12  ;;  %902 = vmatprep.subr.bf16.mxu1 %v961_v46  ;;  %p988_p2 = por %p987_p1, %p986_p0 }
  0x1e   : > { %892 = vmatprep.subr.bf16.mxu0 %v958_v13  ;;  %p982_p13 = pneg %p981_p12 }
  0x20   : > { %p989_p3 = pnand %p988_p2, %p982_p13 }
  0x21   : > { %893 = vmatpush3.bf16.msra.mxu0 %v958_v13 }
  0x22   : > { %894 = vmatprep.subr.bf16.mxu0 %v959_v29 }
  0x25   : > { %895 = vmatpush3.bf16.msra.mxu0 %v959_v29 }
  0x26   : > { %896 = vmatprep.subr.bf16.mxu0 %v960_v30 }
  0x29   : > { %897 = vmatpush3.bf16.msra.mxu0 %v960_v30 }
  0xef   : > { %v876_v15 = vpop.f32.mrb[0].mxu0 }
  0xf0   : > { %v414_v16 = vadd.f32 %v876_v15, %v816_v14  ;;  %v405_v17 = vpop.f32.mrb[1].mxu0 }
  0xf1   : > { %v406_v18 = vadd.f32 %v816_v14, %v405_v17  ;;  %v877_v19 = vpop.f32.mrb[2].mxu0 }
  0xf2   : > { %v417_v20 = vadd.f32 %v877_v19, %v816_v14  ;;  %v408_v21 = vpop.f32.mrb[3].mxu0  ;;  %v422_v23 = vmax.f32 %v414_v16, 0.0 }
  0xf3   : > { %v409_v22 = vadd.f32 %v816_v14, %v408_v21  ;;  %v420_v25 = vmax.f32 %v406_v18, 0.0 }
  0xf4   : > { %v423_v24 = vmax.f32 %v417_v20, 0.0 }
  0xf5   : > { %v421_v26 = vmax.f32 %v409_v22, 0.0 }
  0xf6   : > { %v425_v27 = vpack.c.bf16 %v423_v24, %v422_v23 }
  0xf7   : > { %v424_v28 = vpack.c.bf16 %v421_v26, %v420_v25 }
  0xf9   : > { %886 = vmatprep.mubr.msk.bf16.mxu1 %vm465_vm1, %v424_v28 }
  0xfa   : > { %887 = vmatmul.mubr.msk.bf16.vlgmr.msra.gmra.mrb[0].mxu1 %vm465_vm1, %v425_v27 }
  0xfb   : > { %903 = vmatpush3.bf16.msra.mxu1 %v961_v46 }
  0xfc   : > { %904 = vmatprep.subr.bf16.mxu1 %v962_v47 }
  0xff   : > { %905 = vmatpush3.bf16.msra.mxu1 %v962_v47 }
 0x1cd   : > { %v888_v32 = vpop.f32.mrb[0].mxu1 }
 0x1ce   : > { %v515_v33 = vadd.f32 %v888_v32, %v821_v31  ;;  %v506_v34 = vpop.f32.mrb[1].mxu1 }
 0x1cf   : > { %v507_v35 = vadd.f32 %v821_v31, %v506_v34  ;;  %v889_v36 = vpop.f32.mrb[2].mxu1 }
 0x1d0   : > { %v518_v37 = vadd.f32 %v889_v36, %v821_v31  ;;  %v509_v38 = vpop.f32.mrb[3].mxu1  ;;  %v523_v40 = vmax.f32 %v515_v33, 0.0 }
 0x1d1   : > { %v510_v39 = vadd.f32 %v821_v31, %v509_v38  ;;  %v521_v42 = vmax.f32 %v507_v35, 0.0 }
 0x1d2   : > { %v524_v41 = vmax.f32 %v518_v37, 0.0 }
 0x1d3   : > { %v522_v43 = vmax.f32 %v510_v39, 0.0 }
 0x1d4   : > { %v526_v44 = vpack.c.bf16 %v524_v41, %v523_v40 }
 0x1d5   : > { %v525_v45 = vpack.c.bf16 %v522_v43, %v521_v42 }
 0x1d7   : > { %898 = vmatprep.mubr.msk.bf16.mxu0 %vm465_vm1, %v525_v45 }
 0x1d8   : > { %899 = vmatmul.mubr.msk.bf16.vlgmr.msra.gmra.mrb[4].mxu0 %vm465_vm1, %v526_v44 }
 0x2ab   : > { %v900_v49 = vpop.f32.mrb[4].mxu0 }
 0x2ac   : > { %v615_v50 = vadd.f32 %v900_v49, %v828_v48  ;;  %v606_v51 = vpop.f32.mrb[5].mxu0 }
 0x2ad   : > { %v607_v52 = vadd.f32 %v828_v48, %v606_v51  ;;  %v901_v53 = vpop.f32.mrb[6].mxu0 }
 0x2ae   : > { %v618_v54 = vadd.f32 %v901_v53, %v828_v48  ;;  %v609_v55 = vpop.f32.mrb[7].mxu0  ;;  %v623_v57 = vmax.f32 %v615_v50, 0.0 }
 0x2af   : > { %v610_v56 = vadd.f32 %v828_v48, %v609_v55  ;;  %v621_v59 = vmax.f32 %v607_v52, 0.0 }
 0x2b0   : > { %v624_v58 = vmax.f32 %v618_v54, 0.0 }
 0x2b1   : > { %v622_v60 = vmax.f32 %v610_v56, 0.0 }
 0x2b2   : > { %v626_v61 = vpack.c.bf16 %v624_v58, %v623_v57 }
 0x2b3   : > { %v625_v62 = vpack.c.bf16 %v622_v60, %v621_v59 }
 0x2b5   : > { %906 = vmatprep.mubr.msk.bf16.mxu1 %vm364_vm0, %v625_v62 }
 0x2b6   : > { %907 = vmatmul.mubr.msk.bf16.vlgmr.msra.gmra.mrb[4].mxu1 %vm364_vm0, %v626_v61 }
 0x389   : > { %v908_v0 = vpop.f32.mrb[4].mxu1 }
 0x38a   : > { %v699_v1 = vadd.f32 %v908_v0, %v835_v63  ;;  %v690_v2 = vpop.f32.mrb[5].mxu1 }
 0x38b   : > { %v691_v3 = vadd.f32 %v835_v63, %v690_v2  ;;  %v909_v4 = vpop.f32.mrb[6].mxu1 }
 0x38c   : > { %v842_v5 = vmul.f32 -1.442695, %v699_v1  ;;  %v702_v6 = vadd.f32 %v909_v4, %v835_v63  ;;  %v693_v7 = vpop.f32.mrb[7].mxu1 }
 0x38d   : > { %v840_v8 = vmul.f32 -1.442695, %v691_v3  ;;  %v694_v9 = vadd.f32 %v835_v63, %v693_v7 }
 0x38e   : > { %963 = vpow2.f32 %v842_v5  ;;  %v843_v10 = vmul.f32 -1.442695, %v702_v6 }
 0x38f   : > { %965 = vpow2.f32 %v840_v8  ;;  %v841_v11 = vmul.f32 -1.442695, %v694_v9 }
 0x390   : > { %967 = vpow2.f32 %v843_v10 }
 0x391   : > { %969 = vpow2.f32 %v841_v11 }
 0x398   : > { %v964_v12 = vpop.eup %963 }
 0x399   : > { %v966_v13 = vpop.eup %965  ;;  %v719_v14 = vadd.f32 1.0, %v964_v12 }
 0x39a   : > { %v968_v15 = vpop.eup %967  ;;  %v717_v16 = vadd.f32 1.0, %v966_v13 }
 0x39b   : > { %v970_v17 = vpop.eup %969  ;;  %971 = vrcp.f32 %v719_v14  ;;  %v720_v18 = vadd.f32 1.0, %v968_v15 }
 0x39c   : > { %973 = vrcp.f32 %v717_v16  ;;  %v718_v19 = vadd.f32 1.0, %v970_v17 }
 0x39d   : > { %975 = vrcp.f32 %v720_v18 }
 0x39e   : > { %977 = vrcp.f32 %v718_v19 }
 0x3a5   : > { %v972_v20 = vpop.eup %971 }
 0x3a6   : > { %v974_v21 = vpop.eup %973  ;;  %731 = vst [vmem:[%s326_s25 + $0x10] sm:$0xff] %v972_v20 }
 0x3a7   : > { %v976_v22 = vpop.eup %975  ;;  %729 = vst [vmem:[%s326_s25] sm:$0xff] %v974_v21 }
 0x3a8   : > { %v978_v23 = vpop.eup %977  ;;  %732 = vst [vmem:[%s326_s25 + $0x18] sm:$0xff] %v976_v22 }
 0x3a9   : > { %730 = vst [vmem:[%s326_s25 + $0x8] sm:$0xff] %v978_v23 }
 0x3aa   : > { %992 = shalt.err (!%p989_p3)
}
 0x3ab   : > { %s993_s22 = scalar_lea.hbm %s1209_s29, 512  ;;  %s997_s25 = scalar_lea.hbm %s1263_s9, 1024 }
 0x3ac   : > { %p994_p4 = scmp.ne.s32.totalorder %s1209_s29, %s993_s22  ;;  %p998_p9 = scmp.lt.u32.totalorder %s1209_s29, %s1263_s9 }
 0x3ad   : > { %p999_p10 = scmp.lt.u32.totalorder %s997_s25, %s993_s22  ;;  %p1001_p12 = scmp.lt.u32.totalorder %s993_s22, %s1209_s29 }
 0x3ae   : > { %p995_p7 = pnand %p994_p4, %p1134_p5 }
 0x3af   : > { %p1000_p11 = por %p999_p10, %p998_p9 }
 0x3b0   : > { %p996_p8 = pneg %p995_p7 }
 0x3b1   : > { %p1002_p13 = por %p1001_p12, %p1000_p11 }
 0x3b3   : > { %p1003_p0 = pnand %p1002_p13, %p996_p8 }
 0x3b5   : > { %1006 = shalt.err (!%p1003_p0)
}
 0x3b6   : > { %s1044_s14 = smov 128   ;;  %s1045_s16 = smov 8  }
 0x3b7   : > { %910 = dma.vmem_to_hbm [thread:$0]  (%p1134_p5), %s1211_s26, 512, %s1209_s29, %s1213_s13, %s1044_s14, %s1044_s14, %s1045_s16  }
 0x3b8 PF: > { %p916_p1 = scmp.ge.s32.totalorder %s1041_s12, 2  ;;  %s762_s17 = sand.u32 1, %s1029_s30  }
 0x3b9   : > { %s763_s21 = scalar_lea.sflag [#allocation3], %s762_s17 }
 0x3ba   : > { %p913_p2 = pnand %p916_p1, %p1138_p6 }
 0x3bc   : > { %1024 = dma.done.wait (!%p913_p2), %s763_s21, 512  }
 0x3bd   : > { %1026 = vsyncadd (!%p913_p2), %s763_s21, 4294966784  ;;  %p19_p3 = scmp.ge.s32.totalorder %s1121_s15, 4   ;;  %s1266_s30 = smov %s1033_s10 }
 0x3be   : > { %s1267_s10 = smov %s1037_s11  ;;  %s1268_s11 = smov %s1132_s18 }
 0x3bf   : > { %s1269_s12 = smov %s1121_s15  ;;  %21 = sbr.rel (!%p19_p3) target bundleno = 3 (0x3), region = 91 }
 0x3c6   :  { %768 = vsyncpa [#allocation3], 1 }
 0x3c7   :  { %770 = vsyncpa [#allocation3 + $0x1], 1 }

// kernel: tpu_custom_call.1
= control target key start
LH: loop header
LB: loop body
LE: loop exit
PB: predicated region body
PF: predicated region fallthrough
CT: control target
= control target key end

     0   :  { %14 = vsyncpa [#allocation3], 0  ;;  %s1254_s0 = inlined_call_operand.vmem [shape: f32[64,32], index: 0, kind: input, shape index: {}]   ;;  %s1255_s1 = inlined_call_operand.vmem [shape: bf16[32,64], index: 1, kind: input, shape index: {}]   ;;  %s1256_s2 = inlined_call_operand.vmem [shape: f32[1,64], index: 2, kind: input, shape index: {}]   ;;  %s1257_s3 = inlined_call_operand.vmem [shape: bf16[64,64], index: 3, kind: input, shape index: {}]   ;;  %s1258_s4 = inlined_call_operand.vmem [shape: f32[1,64], index: 4, kind: input, shape index: {}]   ;;  %s1259_s5 = inlined_call_operand.vmem [shape: bf16[64,32], index: 5, kind: input, shape index: {}]   ;;  %s1260_s6 = inlined_call_operand.vmem [shape: f32[1,32], index: 6, kind: input, shape index: {}]   ;;  %s1261_s7 = inlined_call_operand.vmem [shape: bf16[32,128], index: 7, kind: input, shape index: {}]   ;;  %s1262_s8 = inlined_call_operand.vmem [shape: f32[1,128], index: 8, kind: input, shape index: {}]   ;;  %s1263_s9 = inlined_call_operand.hbm [shape: f32[64,128], index: 9, kind: output, shape index: {}]  }
   0x1   :  { %16 = vsyncpa [#allocation3 + $0x1], 0  ;;  %s1096_s30 = smov 0   ;;  %s1098_s10 = smov 0  }
   0x2   :  { %s1100_s11 = smov 0   ;;  %s1102_s12 = smov 0  }
   0x3 LB: > { %s1117_s13 = sadd.s32 4294967295, %s1041_s12   ;;  %s809_s14 = sadd.s32 4294967294, %s1041_s12   ;;  %s1041_s12 = sphi %s1102_s12, %s1269_s12   ;;  %s1037_s11 = sphi %s1100_s11, %s1268_s11   ;;  %s1033_s10 = sphi %s1098_s10, %s1267_s10   ;;  %s1029_s30 = sphi %s1096_s30, %s1266_s30  }
   0x4   : > { %s1121_s15 = sadd.s32 1, %s1041_s12   ;;  %s223_s16 = sadd.s32 1, %s1037_s11 }
   0x5   : > { %s220_s17 = ssub.s32 %s1041_s12, %s1121_s15  ;;  %p233_p0 = scmp.ne.s32.totalorder %s1037_s11, %s1033_s10 }
   0x6   : > { %p221_p1 = scmp.eq.s32.totalorder %s220_s17, 0  ;;  %p234_p2 = scmp.eq.s32.totalorder %s1117_s13, 1 }
   0x7   : > { %p239_p3 = scmp.ne.s32.totalorder %s1033_s10, %s1029_s30  ;;  %p240_p4 = scmp.eq.s32.totalorder %s809_s14, 1 }
   0x8   : > { %s1132_s18 = scalar_select %p221_p1, %s1037_s11, %s223_s16  }
   0x9   : > { %p1134_p5 = por %p234_p2, %p233_p0  ;;  %p1138_p6 = por %p240_p4, %p239_p3 }
   0xa   : > { %p812_p7 = scmp.ge.s32.totalorder %s1041_s12, 1  ;;  %p291_p8 = scmp.lt.s32.totalorder %s1041_s12, 3 }
   0xc   : > { %p292_p9 = pnand %p812_p7, %p291_p8 }
   0xd   : > { %v951_v0 = vld [vmem:[%s1255_s1] sm:$0xff] (!%p292_p9)   ;;  %s814_s23 = sshll.u32 (!%p292_p9), %s1117_s13, 2  ;;  %v952_v1 = vld [vmem:[%s1255_s1 + $0x8] sm:$0xff] (!%p292_p9)   ;;  %vm364_vm0 = vcmask (!%p292_p9), 261120   ;;  %v955_v10 = vld [vmem:[%s1257_s3 + $0x10] sm:$0xff] (!%p292_p9)   ;;  %vm465_vm1 = vcmask (!%p292_p9), 523264  }
   0xe   : > { %295 = sbr.rel (%p292_p9) target bundleno = 952 (0x3b8), region = 56  ;;  %p328_p10 = scmp.lt.s32.totalorder (!%p292_p9), %s814_s23, 7  ;;  %870 = vmatprep.subr.bf16.mxu0 (!%p292_p9), %v951_v0  ;;  %v953_v2 = vld [vmem:[%s1257_s3] sm:$0xff] (!%p292_p9)   ;;  %v954_v3 = vld [vmem:[%s1257_s3 + $0x8] sm:$0xff] (!%p292_p9)   ;;  %v956_v11 = vld [vmem:[%s1257_s3 + $0x18] sm:$0xff] (!%p292_p9)  }
   0xf   : > { %871 = vmatpush3.bf16.msra.mxu0 (!%p292_p9), %v951_v0  ;;  %878 = vmatprep.subr.bf16.mxu1 (!%p292_p9), %v953_v2  ;;  %v957_v12 = vld [vmem:[%s1259_s5] sm:$0xff] (!%p292_p9)   ;;  %v958_v13 = vld [vmem:[%s1259_s5 + $0x8] sm:$0xff] (!%p292_p9)   ;;  %v959_v29 = vld [vmem:[%s1259_s5 + $0x10] sm:$0xff] (!%p292_p9)   ;;  %s324_s22 = sand.u32 (!%p292_p9), 1, %s1033_s10   ;;  %s849_s24 = sshll.u32 (!%p292_p9), %s1117_s13, 9 }
  0x10   : > { %872 = vmatprep.subr.bf16.mxu0 (!%p292_p9), %v952_v1  ;;  %879 = vmatpush3.bf16.msra.mxu1 (!%p292_p9), %v953_v2  ;;  %v816_v14 = vld [vmem:[%s1256_s2] ss:$0 sm:$0xff] (!%p292_p9)  ;;  %v960_v30 = vld [vmem:[%s1259_s5 + $0x18] sm:$0xff] (!%p292_p9)   ;;  %v962_v47 = vld [vmem:[%s1261_s7 + $0x8] sm:$0xff] (!%p292_p9)   ;;  %s1209_s29 = scalar_lea.hbm (!%p292_p9), %s1263_s9, %s849_s24  ;;  %s1213_s13 = scalar_lea.sflag (!%p292_p9), [#allocation3], %s324_s22 }
  0x11   : > { %880 = vmatprep.subr.bf16.mxu1 (!%p292_p9), %v954_v3  ;;  %v821_v31 = vld [vmem:[%s1258_s4] ss:$0 sm:$0xff] (!%p292_p9)  ;;  %s1043_s16 = smov (!%p292_p9), [#allocation2]  }
  0x12   : > { %v961_v46 = vld [vmem:[%s1261_s7] sm:$0xff] (!%p292_p9)   ;;  %s983_s17 = sshll.u32 (!%p292_p9), %s1043_s16, 4  ;;  %s984_s17 = int_to_ptr.vmem [resolvable:$false] %s983_s17 }
  0x13   : > { %873 = vmatpush3.bf16.msra.mxu0 (!%p292_p9), %v952_v1  ;;  %v828_v48 = vld [vmem:[%s1260_s6] ss:$0 sm:$0xff] (!%p292_p9) }
  0x14   : > { %881 = vmatpush3.bf16.msra.mxu1 (!%p292_p9), %v954_v3  ;;  %890 = vmatprep.subr.bf16.mxu0 (!%p292_p9), %v957_v12  ;;  %v835_v63 = vld [vmem:[%s1262_s8] ss:$0 sm:$0xff] (!%p292_p9) }
  0x15   : > { %s1271_s23 = smov (!%p328_p10, %s814_s23), 7  ;;  %882 = vmatprep.subr.bf16.mxu1 %v955_v10 }
  0x16   : > { %s815_s14 = sshll.u32 %s1271_s23, 3  ;;  %s813_s23 = sshll.u32 %s324_s22, 5 }
  0x17   : > { %s331_s21 = scalar_lea.vmem %s1254_s0, %s815_s14  ;;  %s326_s25 = scalar_lea.vmem [#allocation2], %s813_s23 }
  0x18   : > { %v335_v4 = vld [vmem:[%s331_s21] sm:$0xff]  ;;  %v336_v5 = vld [vmem:[%s331_s21 + $0x8] sm:$0xff]  ;;  %v337_v6 = vld [vmem:[%s331_s21 + $0x10] sm:$0xff]  ;;  %883 = vmatpush3.bf16.msra.mxu1 %v955_v10  ;;  %s747_s26 = sshll.u32 %s326_s25, 4  ;;  %s1211_s26 = int_to_ptr.vmem [resolvable:$true] %s747_s26 }
  0x19   : > { %v339_v7 = vpack.c.bf16 %v336_v5, %v335_v4  ;;  %v338_v8 = vld [vmem:[%s331_s21 + $0x18] sm:$0xff]  ;;  %884 = vmatprep.subr.bf16.mxu1 %v956_v11  ;;  %s979_s14 = scalar_lea.vmem %s1211_s26, 512  ;;  %s985_s21 = scalar_lea.vmem %s984_s17, 1024 }
  0x1a   : > { %v340_v9 = vpack.c.bf16 %v338_v8, %v337_v6  ;;  %p980_p11 = scmp.ne.s32.totalorder %s1211_s26, %s979_s14  ;;  %p986_p0 = scmp.lt.s32.totalorder %s1211_s26, %s984_s17 }
  0x1b   : > { %874 = vmatprep.mubr.msk.bf16.mxu0 %vm364_vm0, %v339_v7  ;;  %p987_p1 = scmp.lt.s32.totalorder %s985_s21, %s979_s14 }
  0x1c   : > { %875 = vmatmul.mubr.msk.bf16.vlgmr.msra.gmra.mrb[0].mxu0 %vm364_vm0, %v340_v9  ;;  %885 = vmatpush3.bf16.msra.mxu1 %v956_v11  ;;  %p981_p12 = pnand %p980_p11, %p1134_p5 }
  0x1d   : > { %891 = vmatpush3.bf16.msra.mxu0 %v957_v12  ;;  %902 = vmatprep.subr.bf16.mxu1 %v961_v46  ;;  %p988_p2 = por %p987_p1, %p986_p0 }
  0x1e   : > { %892 = vmatprep.subr.bf16.mxu0 %v958_v13  ;;  %p982_p13 = pneg %p981_p12 }
  0x20   : > { %p989_p3 = pnand %p988_p2, %p982_p13 }
  0x21   : > { %893 = vmatpush3.bf16.msra.mxu0 %v958_v13 }
  0x22   : > { %894 = vmatprep.subr.bf16.mxu0 %v959_v29 }
  0x25   : > { %895 = vmatpush3.bf16.msra.mxu0 %v959_v29 }
  0x26   : > { %896 = vmatprep.subr.bf16.mxu0 %v960_v30 }
  0x29   : > { %897 = vmatpush3.bf16.msra.mxu0 %v960_v30 }
  0xef   : > { %v876_v15 = vpop.f32.mrb[0].mxu0 }
  0xf0   : > { %v414_v16 = vadd.f32 %v876_v15, %v816_v14  ;;  %v405_v17 = vpop.f32.mrb[1].mxu0 }
  0xf1   : > { %v406_v18 = vadd.f32 %v816_v14, %v405_v17  ;;  %v877_v19 = vpop.f32.mrb[2].mxu0 }
  0xf2   : > { %v417_v20 = vadd.f32 %v877_v19, %v816_v14  ;;  %v408_v21 = vpop.f32.mrb[3].mxu0  ;;  %v422_v23 = vmax.f32 %v414_v16, 0.0 }
  0xf3   : > { %v409_v22 = vadd.f32 %v816_v14, %v408_v21  ;;  %v420_v25 = vmax.f32 %v406_v18, 0.0 }
  0xf4   : > { %v423_v24 = vmax.f32 %v417_v20, 0.0 }
  0xf5   : > { %v421_v26 = vmax.f32 %v409_v22, 0.0 }
  0xf6   : > { %v425_v27 = vpack.c.bf16 %v423_v24, %v422_v23 }
  0xf7   : > { %v424_v28 = vpack.c.bf16 %v421_v26, %v420_v25 }
  0xf9   : > { %886 = vmatprep.mubr.msk.bf16.mxu1 %vm465_vm1, %v424_v28 }
  0xfa   : > { %887 = vmatmul.mubr.msk.bf16.vlgmr.msra.gmra.mrb[0].mxu1 %vm465_vm1, %v425_v27 }
  0xfb   : > { %903 = vmatpush3.bf16.msra.mxu1 %v961_v46 }
  0xfc   : > { %904 = vmatprep.subr.bf16.mxu1 %v962_v47 }
  0xff   : > { %905 = vmatpush3.bf16.msra.mxu1 %v962_v47 }
 0x1cd   : > { %v888_v32 = vpop.f32.mrb[0].mxu1 }
 0x1ce   : > { %v515_v33 = vadd.f32 %v888_v32, %v821_v31  ;;  %v506_v34 = vpop.f32.mrb[1].mxu1 }
 0x1cf   : > { %v507_v35 = vadd.f32 %v821_v31, %v506_v34  ;;  %v889_v36 = vpop.f32.mrb[2].mxu1 }
 0x1d0   : > { %v518_v37 = vadd.f32 %v889_v36, %v821_v31  ;;  %v509_v38 = vpop.f32.mrb[3].mxu1  ;;  %v523_v40 = vmax.f32 %v515_v33, 0.0 }
 0x1d1   : > { %v510_v39 = vadd.f32 %v821_v31, %v509_v38  ;;  %v521_v42 = vmax.f32 %v507_v35, 0.0 }
 0x1d2   : > { %v524_v41 = vmax.f32 %v518_v37, 0.0 }
 0x1d3   : > { %v522_v43 = vmax.f32 %v510_v39, 0.0 }
 0x1d4   : > { %v526_v44 = vpack.c.bf16 %v524_v41, %v523_v40 }
 0x1d5   : > { %v525_v45 = vpack.c.bf16 %v522_v43, %v521_v42 }
 0x1d7   : > { %898 = vmatprep.mubr.msk.bf16.mxu0 %vm465_vm1, %v525_v45 }
 0x1d8   : > { %899 = vmatmul.mubr.msk.bf16.vlgmr.msra.gmra.mrb[4].mxu0 %vm465_vm1, %v526_v44 }
 0x2ab   : > { %v900_v49 = vpop.f32.mrb[4].mxu0 }
 0x2ac   : > { %v615_v50 = vadd.f32 %v900_v49, %v828_v48  ;;  %v606_v51 = vpop.f32.mrb[5].mxu0 }
 0x2ad   : > { %v607_v52 = vadd.f32 %v828_v48, %v606_v51  ;;  %v901_v53 = vpop.f32.mrb[6].mxu0 }
 0x2ae   : > { %v618_v54 = vadd.f32 %v901_v53, %v828_v48  ;;  %v609_v55 = vpop.f32.mrb[7].mxu0  ;;  %v623_v57 = vmax.f32 %v615_v50, 0.0 }
 0x2af   : > { %v610_v56 = vadd.f32 %v828_v48, %v609_v55  ;;  %v621_v59 = vmax.f32 %v607_v52, 0.0 }
 0x2b0   : > { %v624_v58 = vmax.f32 %v618_v54, 0.0 }
 0x2b1   : > { %v622_v60 = vmax.f32 %v610_v56, 0.0 }
 0x2b2   : > { %v626_v61 = vpack.c.bf16 %v624_v58, %v623_v57 }
 0x2b3   : > { %v625_v62 = vpack.c.bf16 %v622_v60, %v621_v59 }
 0x2b5   : > { %906 = vmatprep.mubr.msk.bf16.mxu1 %vm364_vm0, %v625_v62 }
 0x2b6   : > { %907 = vmatmul.mubr.msk.bf16.vlgmr.msra.gmra.mrb[4].mxu1 %vm364_vm0, %v626_v61 }
 0x389   : > { %v908_v0 = vpop.f32.mrb[4].mxu1 }
 0x38a   : > { %v699_v1 = vadd.f32 %v908_v0, %v835_v63  ;;  %v690_v2 = vpop.f32.mrb[5].mxu1 }
 0x38b   : > { %v691_v3 = vadd.f32 %v835_v63, %v690_v2  ;;  %v909_v4 = vpop.f32.mrb[6].mxu1 }
 0x38c   : > { %v842_v5 = vmul.f32 -1.442695, %v699_v1  ;;  %v702_v6 = vadd.f32 %v909_v4, %v835_v63  ;;  %v693_v7 = vpop.f32.mrb[7].mxu1 }
 0x38d   : > { %v840_v8 = vmul.f32 -1.442695, %v691_v3  ;;  %v694_v9 = vadd.f32 %v835_v63, %v693_v7 }
 0x38e   : > { %963 = vpow2.f32 %v842_v5  ;;  %v843_v10 = vmul.f32 -1.442695, %v702_v6 }
 0x38f   : > { %965 = vpow2.f32 %v840_v8  ;;  %v841_v11 = vmul.f32 -1.442695, %v694_v9 }
 0x390   : > { %967 = vpow2.f32 %v843_v10 }
 0x391   : > { %969 = vpow2.f32 %v841_v11 }
 0x398   : > { %v964_v12 = vpop.eup %963 }
 0x399   : > { %v966_v13 = vpop.eup %965  ;;  %v719_v14 = vadd.f32 1.0, %v964_v12 }
 0x39a   : > { %v968_v15 = vpop.eup %967  ;;  %v717_v16 = vadd.f32 1.0, %v966_v13 }
 0x39b   : > { %v970_v17 = vpop.eup %969  ;;  %971 = vrcp.f32 %v719_v14  ;;  %v720_v18 = vadd.f32 1.0, %v968_v15 }
 0x39c   : > { %973 = vrcp.f32 %v717_v16  ;;  %v718_v19 = vadd.f32 1.0, %v970_v17 }
 0x39d   : > { %975 = vrcp.f32 %v720_v18 }
 0x39e   : > { %977 = vrcp.f32 %v718_v19 }
 0x3a5   : > { %v972_v20 = vpop.eup %971 }
 0x3a6   : > { %v974_v21 = vpop.eup %973  ;;  %731 = vst [vmem:[%s326_s25 + $0x10] sm:$0xff] %v972_v20 }
 0x3a7   : > { %v976_v22 = vpop.eup %975  ;;  %729 = vst [vmem:[%s326_s25] sm:$0xff] %v974_v21 }
 0x3a8   : > { %v978_v23 = vpop.eup %977  ;;  %732 = vst [vmem:[%s326_s25 + $0x18] sm:$0xff] %v976_v22 }
 0x3a9   : > { %730 = vst [vmem:[%s326_s25 + $0x8] sm:$0xff] %v978_v23 }
 0x3aa   : > { %992 = shalt.err (!%p989_p3)
}
 0x3ab   : > { %s993_s22 = scalar_lea.hbm %s1209_s29, 512  ;;  %s997_s25 = scalar_lea.hbm %s1263_s9, 1024 }
 0x3ac   : > { %p994_p4 = scmp.ne.s32.totalorder %s1209_s29, %s993_s22  ;;  %p998_p9 = scmp.lt.u32.totalorder %s1209_s29, %s1263_s9 }
 0x3ad   : > { %p999_p10 = scmp.lt.u32.totalorder %s997_s25, %s993_s22  ;;  %p1001_p12 = scmp.lt.u32.totalorder %s993_s22, %s1209_s29 }
 0x3ae   : > { %p995_p7 = pnand %p994_p4, %p1134_p5 }
 0x3af   : > { %p1000_p11 = por %p999_p10, %p998_p9 }
 0x3b0   : > { %p996_p8 = pneg %p995_p7 }
 0x3b1   : > { %p1002_p13 = por %p1001_p12, %p1000_p11 }
 0x3b3   : > { %p1003_p0 = pnand %p1002_p13, %p996_p8 }
 0x3b5   : > { %1006 = shalt.err (!%p1003_p0)
}
 0x3b6   : > { %s1044_s14 = smov 128   ;;  %s1045_s16 = smov 8  }
 0x3b7   : > { %910 = dma.vmem_to_hbm [thread:$0]  (%p1134_p5), %s1211_s26, 512, %s1209_s29, %s1213_s13, %s1044_s14, %s1044_s14, %s1045_s16  }
 0x3b8 PF: > { %p916_p1 = scmp.ge.s32.totalorder %s1041_s12, 2  ;;  %s762_s17 = sand.u32 1, %s1029_s30  }
 0x3b9   : > { %s763_s21 = scalar_lea.sflag [#allocation3], %s762_s17 }
 0x3ba   : > { %p913_p2 = pnand %p916_p1, %p1138_p6 }
 0x3bc   : > { %1024 = dma.done.wait (!%p913_p2), %s763_s21, 512  }
 0x3bd   : > { %1026 = vsyncadd (!%p913_p2), %s763_s21, 4294966784  ;;  %p19_p3 = scmp.ge.s32.totalorder %s1121_s15, 4   ;;  %s1266_s30 = smov %s1033_s10 }
 0x3be   : > { %s1267_s10 = smov %s1037_s11  ;;  %s1268_s11 = smov %s1132_s18 }
 0x3bf   : > { %s1269_s12 = smov %s1121_s15  ;;  %21 = sbr.rel (!%p19_p3) target bundleno = 3 (0x3), region = 91 }
 0x3c6   :  { %768 = vsyncpa [#allocation3], 1 }
 0x3c7   :  { %770 = vsyncpa [#allocation3 + $0x1], 1 }

</bundles_post_ra>
